<compile_context>
chip_gen: v7x
topology: tpu7x:2x2x1
jax: 0.10.0
libtpu: 0.0.40
codegen_flags: <defaults>
</compile_context>

<pallas_src>
import jax
import jax.numpy as jnp
from jax.experimental import pallas as pl
from jax.experimental.pallas import tpu as pltpu


def _identity_copy_kernel(x_ref, o_ref):
    # nn.Identity "compute": straight VMEM tile copy.
    o_ref[...] = x_ref[...]


def _pick_lane_width(n: int) -> int:
    """Largest multiple-of-128 lane width (<= 4096) that divides n, else 0."""
    for lane in (4096, 2048, 1024, 512, 256, 128):
        if n % lane == 0:
            return lane
    return 0


def _materialized_copy(x: jax.Array, *, target_tile_bytes: int = 2 << 20) -> jax.Array:
    """Pallas copy of `x` into a fresh buffer (only used when a real copy is asked for)."""
    orig_shape = x.shape
    n = x.size
    lane = _pick_lane_width(n)

    if lane == 0 or n == 0:
        # Irregular total size (not a multiple of 128): single whole-array block.
        # Only hit for small/odd shapes; large tensors from this model are 128-aligned.
        out = pl.pallas_call(
            _identity_copy_kernel,
            out_shape=jax.ShapeDtypeStruct(orig_shape, x.dtype),
        )(x)
        return out

    # Lane-dense 2D view: [rows, lane] with lane a large multiple of 128.
    rows = n // lane
    x2d = x.reshape(rows, lane)

    # Row tile sized for ~target_tile_bytes per tile per array (multiple of 8 sublanes).
    row_bytes = lane * x.dtype.itemsize
    tile_rows = max(8, (target_tile_bytes // row_bytes) // 8 * 8)
    tile_rows = min(tile_rows, rows)

    grid = (pl.cdiv(rows, tile_rows),)

    out2d = pl.pallas_call(
        _identity_copy_kernel,
        out_shape=jax.ShapeDtypeStruct((rows, lane), x.dtype),
        grid_spec=pltpu.PrefetchScalarGridSpec(
            num_scalar_prefetch=0,
            grid=grid,
            in_specs=[pl.BlockSpec((tile_rows, lane), lambda i: (i, 0))],
            out_specs=pl.BlockSpec((tile_rows, lane), lambda i: (i, 0)),
        ),
        compiler_params=pltpu.CompilerParams(
            # 1-D grid; "parallel" lets v7x shard the copy across its 2 TCs.
            dimension_semantics=("parallel",),
            # Generous but safe headroom (2 arrays x 2 buffers x ~2 MiB tiles << 16 MiB).
            vmem_limit_bytes=32 << 20,
        ),
    )(x2d)

    return out2d.reshape(orig_shape)


def encode_image_embeds(image_embeds: jax.Array, *, materialize: bool = False) -> jax.Array:
    """Pallas equivalent of DiscreteModleIdentity.encode_image_embeds.

    nn.Identity has no compute, so by default this returns the input unchanged
    (zero HBM traffic).  Set materialize=True only if a fresh output buffer is
    explicitly required; that path uses the optimized lane-dense Pallas copy.
    """
    if not materialize:
        return image_embeds
    return _materialized_copy(image_embeds)


def forward(image_embeds, input_ids=None, text_attention_mask=None, text_embeds=None):
    """Matches DiscreteModleIdentity.forward, which performs no computation and returns None."""
    # TODO(synk): PyTorch forward returns None with no computation; nothing to kernelize.
    return None


if __name__ == "__main__":
    key = jax.random.PRNGKey(0)
    B, S, D = 2, 8, 32  # small image-embed tensor [batch, seq, hidden]
    image_embeds = jax.random.normal(key, (B, S, D), dtype=jnp.float32)

    # forward() returns None, per the reference module.
    assert forward(image_embeds) is None

    # Default identity path: no kernel, no copy.
    out = encode_image_embeds(image_embeds)
    assert out.shape == image_embeds.shape
    assert out.dtype == image_embeds.dtype
    assert bool(jnp.array_equal(out, image_embeds))

    # Materialized-copy path: exercises the lane-dense Pallas copy kernel.
    out_copy = jax.block_until_ready(encode_image_embeds(image_embeds, materialize=True))
    assert out_copy.shape == image_embeds.shape
    assert out_copy.dtype == image_embeds.dtype
    assert bool(jnp.array_equal(out_copy, image_embeds))

    # Also exercise the irregular-size fallback (total elements not a multiple of 128).
    odd = jax.random.normal(jax.random.PRNGKey(1), (2, 3, 5), dtype=jnp.float32)
    odd_copy = jax.block_until_ready(encode_image_embeds(odd, materialize=True))
    assert bool(jnp.array_equal(odd_copy, odd))

    print("KERNEL_OK")
</pallas_src>

<mosaic_0001>
module attributes {stable_mosaic.version = 11 : i64} {
  func.func @_identity_copy_kernel(%arg0: i32, %arg1: memref<1x512xf32, #tpu.memory_space<vmem>>, %arg2: memref<1x512xf32, #tpu.memory_space<vmem>>) attributes {dimension_semantics = [#tpu.dimension_semantics<parallel>], iteration_bounds = array<i64: 1>, scalar_prefetch = 0 : i64, scratch_operands = 0 : i64, tpu.core_type = #tpu.core_type<tc>, window_params = [{transform_indices = @transform_0, window_bounds = array<i64: 1, 512>}, {transform_indices = @transform_1, window_bounds = array<i64: 1, 512>}]} {
    %c0 = arith.constant 0 : index
    %c0_0 = arith.constant 0 : index
    %0 = vector.load %arg1[%c0, %c0_0] : memref<1x512xf32, #tpu.memory_space<vmem>>, vector<1x512xf32>
    %c0_1 = arith.constant 0 : index
    %c0_2 = arith.constant 0 : index
    %1 = vector.load %arg2[%c0_1, %c0_2] : memref<1x512xf32, #tpu.memory_space<vmem>>, vector<1x512xf32>
    tpu.vector_store %arg2[%c0_1, %c0_2], %0 {strides = array<i32>} : memref<1x512xf32, #tpu.memory_space<vmem>>, vector<1x512xf32>,
    return
  }
  func.func @transform_0(%arg0: i32) -> (i32, i32) {
    %c0_i32 = arith.constant 0 : i32
    %c0_i32_0 = arith.constant 0 : i32
    return %arg0, %c0_i32 : i32, i32
  }
  func.func @transform_1(%arg0: i32) -> (i32, i32) {
    %c0_i32 = arith.constant 0 : i32
    %c0_i32_0 = arith.constant 0 : i32
    return %arg0, %c0_i32 : i32, i32
  }
}

</mosaic_0001>

<bundles_post_ra>
// kernel: tpu_custom_call.1
= control target key start
LH: loop header
LB: loop body
LE: loop exit
PB: predicated region body
PF: predicated region fallthrough
CT: control target
= control target key end

     0   :  { %6 = vsyncpa [#allocation3], 0  ;;  %s128_s0 = inlined_call_operand.hbm [shape: f32[1,512], index: 0, kind: input, shape index: {}]   ;;  %s129_s1 = inlined_call_operand.hbm [shape: f32[1,512], index: 1, kind: output, shape index: {}]  }
   0x1   :  { %7 = vsyncpa [#allocation4], 0  ;;  %s92_s6 = smov [#allocation2]   ;;  %s44_s10 = scalar_lea.hbm %s128_s0, 64 }
   0x2   :  { %s14_s7 = sshll.u32 %s92_s6, 4  ;;  %p45_p0 = scmp.ne.s32.totalorder %s128_s0, %s44_s10  ;;  %s15_s7 = int_to_ptr.vmem [resolvable:$true] %s14_s7 }
   0x3   :  { %p48_p1 = scmp.lt.u32.totalorder %s44_s10, %s128_s0 }
   0x5   :  { %p50_p2 = pnand %p48_p1, %p45_p0 }
   0x7   :  { %53 = shalt.err (!%p50_p2)
}
   0x8   :  { %s54_s15 = scalar_lea.vmem %s15_s7, 64  ;;  %p59_p4 = scmp.lt.s32.totalorder %s15_s7, %s15_s7 }
   0x9   :  { %p55_p3 = scmp.ne.s32.totalorder %s15_s7, %s54_s15  ;;  %p60_p5 = scmp.lt.s32.totalorder %s54_s15, %s54_s15 }
   0xb   :  { %p61_p6 = por %p60_p5, %p59_p4 }
   0xd   :  { %p62_p7 = pnand %p61_p6, %p55_p3 }
   0xf   :  { %65 = shalt.err (!%p62_p7)
}
  0x10   :  { %17 = dma.hbm_to_vmem [thread:$0]  %s128_s0, 64, %s15_s7, [#allocation3]  }
  0x11   :  { %88 = dma.done.wait [#allocation3], 64  }
  0x12   :  { %89 = vsyncadd [#allocation3], 4294967232  ;;  %v22_v0 = vlaneseq  ;;  %s93_s18 = smov [#allocation5]   ;;  %v21_v1 = vld [vmem:[#allocation2] sm:$0xf] }
  0x13   :  { %s33_s19 = sshll.u32 %s93_s18, 4  ;;  %s34_s19 = int_to_ptr.vmem [resolvable:$true] %s33_s19 }
  0x14   :  { %vm24_vm0 = vcmp.lt.s32.totalorder %v22_v0, 512  ;;  %s66_s20 = scalar_lea.vmem %s34_s19, 64  ;;  %p71_p9 = scmp.lt.s32.totalorder %s34_s19, %s34_s19 }
  0x15   :  { %26 = vst.msk [vmem:[#allocation5] sm:$0xf] %vm24_vm0, %v21_v1  ;;  %p67_p8 = scmp.ne.s32.totalorder %s34_s19, %s66_s20  ;;  %p72_p10 = scmp.lt.s32.totalorder %s66_s20, %s66_s20 }
  0x17   :  { %p73_p11 = por %p72_p10, %p71_p9 }
  0x19   :  { %p74_p12 = pnand %p73_p11, %p67_p8 }
  0x1b   :  { %77 = shalt.err (!%p74_p12)
}
  0x1c   :  { %s78_s0 = scalar_lea.hbm %s129_s1, 64 }
  0x1d   :  { %p79_p13 = scmp.ne.s32.totalorder %s129_s1, %s78_s0  ;;  %p82_p0 = scmp.lt.u32.totalorder %s78_s0, %s129_s1 }
  0x1f   :  { %p84_p1 = pnand %p82_p0, %p79_p13 }
  0x21   :  { %87 = shalt.err (!%p84_p1)
}
  0x22   :  { %36 = dma.vmem_to_hbm [thread:$0]  %s34_s19, 64, %s129_s1, [#allocation4]  }
  0x23   :  { %90 = dma.done.wait [#allocation4], 64  }
  0x24   :  { %91 = vsyncadd [#allocation4], 4294967232 }
  0x25   :  { %40 = vsyncpa [#allocation3], 1 }
  0x26   :  { %41 = vsyncpa [#allocation4], 1 }

</bundles_post_ra>
